<compile_context>
chip_gen: v7x
topology: tpu7x:2x2x1
jax: 0.10.0
libtpu: 0.0.40
codegen_flags: <defaults>
</compile_context>

<pallas_src>
import functools

import jax
import jax.numpy as jnp
from jax import lax
from jax.experimental import pallas as pl
from jax.experimental.pallas import tpu as pltpu


def _pseudo_cls_kernel(emb_ref, mask_ref, wt_ref, bias_ref, labels_ref, sw_ref,
                       logits_ref, ploss_ref, *, num_labels, batch, tile_b):
    # emb_ref:    (TB, S, H)  input dtype (f32 or bf16), native-dtype DMA
    # mask_ref:   (TB, S)     f32
    # wt_ref:     (H, LP)     f32  out_proj weight, pre-transposed, zero-padded
    # bias_ref:   (1, LP)     f32  out_proj bias, zero-padded
    # labels_ref: (TB, 1)     i32
    # sw_ref:     (TB, 1)     f32
    # logits_ref: (TB, LP)    f32  lane-dense padded logits
    # ploss_ref:  (TB, 1)     f32  weighted per-sample CE loss

    i = pl.program_id(0)
    mask_f = mask_ref[...]                                      # (TB, S) f32

    # _mean_pooling: sum(token_emb * mask, 1) / clamp(sum(mask, 1), 1e-9)
    # Multiply in the embedding's native dtype (mask is exactly 0/1 so a bf16
    # product is exact); accumulate the sequence reduction in f32.
    prod = emb_ref[...] * mask_f.astype(emb_ref.dtype)[:, :, None]
    summed = jnp.sum(prod, axis=1, dtype=jnp.float32)           # (TB, H)
    denom = jnp.maximum(jnp.sum(mask_f, axis=-1, keepdims=True), 1e-9)
    pooled = summed / denom                                     # (TB, H)

    # ClassificationHead (n_dense_layers=0, eval dropout = identity):
    # logits = pooled @ W.T + b, with W.T supplied pre-transposed as (H, LP).
    logits = jnp.dot(pooled, wt_ref[...],
                     preferred_element_type=jnp.float32) + bias_ref[...]
    logits_ref[...] = logits                                    # (TB, LP)

    # CrossEntropyLoss(reduction='none'), restricted to real label columns.
    tb, lp = logits.shape
    col = lax.broadcasted_iota(jnp.int32, (tb, lp), 1)
    valid_col = col < num_labels
    onehot = col == labels_ref[...]          # real labels < num_labels

    neg_big = jnp.float32(-1e30)
    safe = jnp.where(valid_col, logits, neg_big)
    mx = jnp.max(safe, axis=-1, keepdims=True)
    sumexp = jnp.sum(jnp.where(valid_col, jnp.exp(safe - mx), 0.0),
                     axis=-1, keepdims=True)
    lse = jnp.log(sumexp) + mx                                  # (TB, 1)
    picked = jnp.sum(jnp.where(onehot, logits, 0.0), axis=-1, keepdims=True)

    # Row validity for the ragged last tile (no wrapper-side batch padding).
    # Invalid-row garbage reads are zeroed here; their logits-row writes are
    # discarded by Pallas on writeback anyway.
    row = i * tile_b + lax.broadcasted_iota(jnp.int32, (tb, 1), 0)
    row_valid = row < batch

    # torch.mul(per_sample_loss, sample_weights); mean is taken in the wrapper.
    ploss_ref[...] = jnp.where(row_valid, (lse - picked) * sw_ref[...], 0.0)


def _round_up(x, m):
    return ((x + m - 1) // m) * m


def _vmem_capacity_bytes():
    try:
        info = pltpu.get_tpu_info()
        cap = getattr(info, "vmem_capacity_bytes", None)
        if cap:
            return int(cap)
    except Exception:
        pass
    return 64 << 20  # conservative default (v7x-sized)


def _choose_batch_tile(batch, seq, hidden, emb_itemsize, vmem_cap):
    """Batch tile: generation-aware VMEM budget, prefer >=4 grid steps."""
    if batch <= 8:
        # Tiny batch: single full-batch tile (block equals full array dims,
        # so the (8,128) divisibility rule is satisfied by the exemption).
        return int(batch)

    # Embedding-tile budget per generation (v5e/v6e: 128 MiB VMEM; v7x: 64 MiB).
    budget = (16 << 20) if vmem_cap >= (100 << 20) else (10 << 20)

    # Per-row VMEM: double-buffered native-dtype embedding + one f32
    # intermediate (possible materialized product) + mask.
    per_row = seq * hidden * (2 * emb_itemsize + 4) + seq * 8
    tb = max(1, budget // per_row)

    # Prefer >= 4 grid steps so the embedding DMA pipeline has work to overlap
    # and v7x's two TensorCores both get grid steps.
    tb = min(tb, max(8, (batch // 4 // 8) * 8))
    tb = max(8, (tb // 8) * 8)                    # sublane-aligned, >= 8
    # TODO(synk): for extreme S*H (e.g. S=2048, H=1024 bf16) an 8-row tile can
    # still overshoot v7x VMEM; that regime needs an inner sequence-axis grid
    # dimension with a (TB, H) f32 accumulator, not implemented here.
    return int(min(tb, _round_up(batch, 8)))


def pseudo_classification_forward(token_embeddings, attention_mask, w, b,
                                  labels, sample_weights):
    """Returns (loss, logits) matching PseudoClassificationModel.forward.

    token_embeddings may be float32 or bfloat16; they are DMA'd in their
    native dtype (bf16 halves HBM traffic for this memory-bound kernel).
    """
    B, S, H = token_embeddings.shape
    L = w.shape[0]
    LP = _round_up(L, 128)                           # lane-dense logits output
    emb_itemsize = jnp.dtype(token_embeddings.dtype).itemsize

    vmem_cap = _vmem_capacity_bytes()
    TB = _choose_batch_tile(B, S, H, emb_itemsize, vmem_cap)
    n_steps = pl.cdiv(B, TB)

    # Small auxiliary inputs only (no copy of the embeddings).
    mask_f = attention_mask.astype(jnp.float32)
    labels_c = labels.astype(jnp.int32).reshape(B, 1)
    sw_c = sample_weights.astype(jnp.float32).reshape(B, 1)

    # out_proj weight pre-transposed to (H, LP) with zero pad columns; bias (1, LP).
    wt = jnp.zeros((H, LP), jnp.float32).at[:, :L].set(w.T.astype(jnp.float32))
    bias_pad = jnp.zeros((1, LP), jnp.float32).at[:, :L].set(
        b.reshape(1, L).astype(jnp.float32))

    # VMEM estimate, now including a possible materialized f32 product temp.
    est = (2 * TB * S * H * emb_itemsize            # embeddings (double-buffered)
           + TB * S * H * 4                         # f32 product intermediate
           + 2 * TB * S * 4                         # mask
           + 2 * (H * LP + LP) * 4                  # weight + bias
           + 2 * TB * (LP + 2) * 4                  # logits, loss, labels, sw
           + 2 * TB * H * 4)                        # summed / pooled temps
    cap = (40 << 20) if vmem_cap <= (64 << 20) else (64 << 20)
    vmem_limit = min(max(int(est * 1.25) + (2 << 20), 24 << 20), cap)

    kernel = functools.partial(_pseudo_cls_kernel,
                               num_labels=L, batch=B, tile_b=TB)

    logits_p, ploss = pl.pallas_call(
        kernel,
        out_shape=(
            jax.ShapeDtypeStruct((B, LP), jnp.float32),
            jax.ShapeDtypeStruct((B, 1), jnp.float32),
        ),
        grid=(n_steps,),
        in_specs=[
            pl.BlockSpec((TB, S, H), lambda i: (i, 0, 0)),   # embeddings (tiled)
            pl.BlockSpec((TB, S), lambda i: (i, 0)),         # mask (tiled)
            pl.BlockSpec((H, LP), lambda i: (0, 0)),         # W.T (resident)
            pl.BlockSpec((1, LP), lambda i: (0, 0)),         # bias (resident)
            pl.BlockSpec((TB, 1), lambda i: (i, 0)),         # labels
            pl.BlockSpec((TB, 1), lambda i: (i, 0)),         # sample weights
        ],
        out_specs=(
            pl.BlockSpec((TB, LP), lambda i: (i, 0)),        # lane-dense logits
            pl.BlockSpec((TB, 1), lambda i: (i, 0)),         # per-sample loss
        ),
        compiler_params=pltpu.CompilerParams(
            dimension_semantics=("parallel",),
            vmem_limit_bytes=vmem_limit,
        ),
    )(token_embeddings, mask_f, wt, bias_pad, labels_c, sw_c)

    logits = logits_p[:, :L]
    loss = jnp.sum(ploss[:, 0]) / B       # mean over the true batch size
    return loss, logits


def _reference(token_embeddings, attention_mask, w, b, labels, sample_weights):
    m = attention_mask[:, :, None].astype(jnp.float32)
    emb = token_embeddings.astype(jnp.float32)
    pooled = jnp.sum(emb * m, 1) / jnp.maximum(jnp.sum(m, 1), 1e-9)
    logits = pooled @ w.T + b
    lse = jax.nn.logsumexp(logits, axis=-1)
    picked = jnp.take_along_axis(logits, labels[:, None], axis=-1)[:, 0]
    per_sample = (lse - picked) * sample_weights
    return jnp.mean(per_sample), logits


if __name__ == "__main__":
    # Small shapes consistent with the forward pass: batch=2, seq=8, hidden=32,
    # num_labels=4.
    B, S, H, L = 2, 8, 32, 4
    key = jax.random.PRNGKey(0)
    k_emb, k_w, k_lab, k_sw = jax.random.split(key, 4)

    # TODO(synk): base_model is an external pretrained HF transformer with no
    # Pallas equivalent here; its output (token embeddings) is a kernel input.
    token_embeddings = jax.random.normal(k_emb, (B, S, H), dtype=jnp.float32)

    # Attention mask with some padding positions zeroed out.
    attention_mask = jnp.array([[1] * 8, [1] * 5 + [0] * 3], dtype=jnp.float32)

    # ClassificationHead init: out_proj.weight ~ N(0, 0.02), bias = 0.
    w = 0.02 * jax.random.normal(k_w, (L, H), dtype=jnp.float32)
    bias = jnp.zeros((L,), dtype=jnp.float32)

    labels = jax.random.randint(k_lab, (B,), 0, L, dtype=jnp.int32)
    sample_weights = jax.random.uniform(k_sw, (B,), dtype=jnp.float32) + 0.5

    loss, logits = pseudo_classification_forward(
        token_embeddings, attention_mask, w, bias, labels, sample_weights)
    jax.block_until_ready((loss, logits))

    ref_loss, ref_logits = _reference(
        token_embeddings, attention_mask, w, bias, labels, sample_weights)
    assert logits.shape == (B, L)
    assert jnp.allclose(logits, ref_logits, atol=1e-5, rtol=1e-5)
    assert jnp.allclose(loss, ref_loss, atol=1e-5, rtol=1e-5)

    print("KERNEL_OK")
</pallas_src>

<mosaic_0001>
module attributes {stable_mosaic.version = 11 : i64} {
  func.func @_pseudo_cls_kernel(%arg0: i32, %arg1: memref<2x8x32xf32, #tpu.memory_space<vmem>>, %arg2: memref<2x8xf32, #tpu.memory_space<vmem>>, %arg3: memref<32x128xf32, #tpu.memory_space<vmem>>, %arg4: memref<1x128xf32, #tpu.memory_space<vmem>>, %arg5: memref<2x1xi32, #tpu.memory_space<vmem>>, %arg6: memref<2x1xf32, #tpu.memory_space<vmem>>, %arg7: memref<2x128xf32, #tpu.memory_space<vmem>>, %arg8: memref<2x1xf32, #tpu.memory_space<vmem>>) attributes {dimension_semantics = [#tpu.dimension_semantics<parallel>], iteration_bounds = array<i64: 1>, scalar_prefetch = 0 : i64, scratch_operands = 0 : i64, tpu.core_type = #tpu.core_type<tc>, window_params = [{transform_indices = @transform_0, window_bounds = array<i64: 2, 8, 32>}, {transform_indices = @transform_1, window_bounds = array<i64: 2, 8>}, {pipeline_mode = #tpu.pipeline_mode<synchronous>, transform_indices = @transform_2, window_bounds = array<i64: 32, 128>}, {pipeline_mode = #tpu.pipeline_mode<synchronous>, transform_indices = @transform_3, window_bounds = array<i64: 1, 128>}, {transform_indices = @transform_4, window_bounds = array<i64: 2, 1>}, {transform_indices = @transform_5, window_bounds = array<i64: 2, 1>}, {transform_indices = @transform_6, window_bounds = array<i64: 2, 128>}, {transform_indices = @transform_7, window_bounds = array<i64: 2, 1>}]} {
    %c0 = arith.constant 0 : index
    %c0_0 = arith.constant 0 : index
    %0 = vector.load %arg2[%c0, %c0_0] : memref<2x8xf32, #tpu.memory_space<vmem>>, vector<2x8xf32>
    %c0_1 = arith.constant 0 : index
    %c0_2 = arith.constant 0 : index
    %c0_3 = arith.constant 0 : index
    %1 = vector.load %arg1[%c0_1, %c0_2, %c0_3] : memref<2x8x32xf32, #tpu.memory_space<vmem>>, vector<2x8x32xf32>
    %2 = vector.shape_cast %0 : vector<2x8xf32> to vector<2x8x1xf32>
    %3 = vector.broadcast %2 : vector<2x8x1xf32> to vector<2x8x32xf32>
    %4 = arith.mulf %1, %3 : vector<2x8x32xf32>
    %cst = arith.constant dense<0.000000e+00> : vector<2x32xf32>
    %5 = vector.multi_reduction <add>, %4, %cst [1] : vector<2x8x32xf32> to vector<2x32xf32>
    %cst_4 = arith.constant dense<0.000000e+00> : vector<2xf32>
    %6 = vector.multi_reduction <add>, %0, %cst_4 [1] : vector<2x8xf32> to vector<2xf32>
    %7 = vector.shape_cast %6 : vector<2xf32> to vector<2x1xf32>
    %cst_5 = arith.constant 9.99999971E-10 : f32
    %8 = vector.broadcast %cst_5 : f32 to vector<2x1xf32>
    %9 = arith.maximumf %7, %8 : vector<2x1xf32>
    %10 = vector.broadcast %9 : vector<2x1xf32> to vector<2x32xf32>
    %11 = arith.divf %5, %10 : vector<2x32xf32>
    %c0_6 = arith.constant 0 : index
    %c0_7 = arith.constant 0 : index
    %12 = vector.load %arg3[%c0_6, %c0_7] : memref<32x128xf32, #tpu.memory_space<vmem>>, vector<32x128xf32>
    %cst_8 = arith.constant dense<0.000000e+00> : vector<2x128xf32>
    %13 = tpu.matmul %11, %12, %cst_8 {dimension_numbers = #tpu.dot_dimension_numbers<[1], [0], [0], [1], [0, 0, 1, 1], [], []>} : vector<2x32xf32>, vector<32x128xf32>, vector<2x128xf32> -> vector<2x128xf32>
    %c0_9 = arith.constant 0 : index
    %c0_10 = arith.constant 0 : index
    %14 = vector.load %arg4[%c0_9, %c0_10] : memref<1x128xf32, #tpu.memory_space<vmem>>, vector<1x128xf32>
    %15 = vector.broadcast %14 : vector<1x128xf32> to vector<2x128xf32>
    %16 = arith.addf %13, %15 : vector<2x128xf32>
    %c0_11 = arith.constant 0 : index
    %c0_12 = arith.constant 0 : index
    %17 = vector.load %arg7[%c0_11, %c0_12] : memref<2x128xf32, #tpu.memory_space<vmem>>, vector<2x128xf32>
    tpu.vector_store %arg7[%c0_11, %c0_12], %16 {strides = array<i32>} : memref<2x128xf32, #tpu.memory_space<vmem>>, vector<2x128xf32>,
    %18 = tpu.iota {dimensions = array<i32: 1>} : vector<2x128xi32>
    %c4_i32 = arith.constant 4 : i32
    %19 = vector.broadcast %c4_i32 : i32 to vector<2x128xi32>
    %20 = arith.cmpi slt, %18, %19 : vector<2x128xi32>
    %c0_13 = arith.constant 0 : index
    %c0_14 = arith.constant 0 : index
    %21 = vector.load %arg5[%c0_13, %c0_14] : memref<2x1xi32, #tpu.memory_space<vmem>>, vector<2x1xi32>
    %22 = vector.broadcast %21 : vector<2x1xi32> to vector<2x128xi32>
    %23 = arith.cmpi eq, %18, %22 : vector<2x128xi32>
    %cst_15 = arith.constant -1.000000e+30 : f32
    %24 = vector.broadcast %cst_15 : f32 to vector<2x128xf32>
    %25 = arith.select %20, %16, %24 : vector<2x128xi1>, vector<2x128xf32>
    %cst_16 = arith.constant dense<0xFF800000> : vector<2xf32>
    %26 = vector.multi_reduction <maximumf>, %25, %cst_16 [1] : vector<2x128xf32> to vector<2xf32>
    %27 = vector.shape_cast %26 : vector<2xf32> to vector<2x1xf32>
    %28 = vector.broadcast %27 : vector<2x1xf32> to vector<2x128xf32>
    %29 = arith.subf %25, %28 : vector<2x128xf32>
    %30 = math.exp %29 : vector<2x128xf32>
    %cst_17 = arith.constant 0.000000e+00 : f32
    %31 = vector.broadcast %cst_17 : f32 to vector<2x128xf32>
    %32 = arith.select %20, %30, %31 : vector<2x128xi1>, vector<2x128xf32>
    %cst_18 = arith.constant dense<0.000000e+00> : vector<2xf32>
    %33 = vector.multi_reduction <add>, %32, %cst_18 [1] : vector<2x128xf32> to vector<2xf32>
    %34 = vector.shape_cast %33 : vector<2xf32> to vector<2x1xf32>
    %35 = math.log %34 : vector<2x1xf32>
    %36 = arith.addf %35, %27 : vector<2x1xf32>
    %cst_19 = arith.constant 0.000000e+00 : f32
    %37 = vector.broadcast %cst_19 : f32 to vector<2x128xf32>
    %38 = arith.select %23, %16, %37 : vector<2x128xi1>, vector<2x128xf32>
    %cst_20 = arith.constant dense<0.000000e+00> : vector<2xf32>
    %39 = vector.multi_reduction <add>, %38, %cst_20 [1] : vector<2x128xf32> to vector<2xf32>
    %40 = vector.shape_cast %39 : vector<2xf32> to vector<2x1xf32>
    %c2_i32 = arith.constant 2 : i32
    %41 = arith.muli %arg0, %c2_i32 : i32
    %42 = tpu.iota {dimensions = array<i32: 0>} : vector<2x1xi32>
    %43 = vector.broadcast %41 : i32 to vector<2x1xi32>
    %44 = arith.addi %43, %42 : vector<2x1xi32>
    %c2_i32_21 = arith.constant 2 : i32
    %45 = vector.broadcast %c2_i32_21 : i32 to vector<2x1xi32>
    %46 = arith.cmpi slt, %44, %45 : vector<2x1xi32>
    %47 = arith.subf %36, %40 : vector<2x1xf32>
    %c0_22 = arith.constant 0 : index
    %c0_23 = arith.constant 0 : index
    %48 = vector.load %arg6[%c0_22, %c0_23] : memref<2x1xf32, #tpu.memory_space<vmem>>, vector<2x1xf32>
    %49 = arith.mulf %47, %48 : vector<2x1xf32>
    %cst_24 = arith.constant 0.000000e+00 : f32
    %50 = vector.broadcast %cst_24 : f32 to vector<2x1xf32>
    %51 = arith.select %46, %49, %50 : vector<2x1xi1>, vector<2x1xf32>
    %c0_25 = arith.constant 0 : index
    %c0_26 = arith.constant 0 : index
    %52 = vector.load %arg8[%c0_25, %c0_26] : memref<2x1xf32, #tpu.memory_space<vmem>>, vector<2x1xf32>
    tpu.vector_store %arg8[%c0_25, %c0_26], %51 {strides = array<i32>} : memref<2x1xf32, #tpu.memory_space<vmem>>, vector<2x1xf32>,
    return
  }
  func.func @transform_0(%arg0: i32) -> (i32, i32, i32) {
    %c0_i32 = arith.constant 0 : i32
    %c0_i32_0 = arith.constant 0 : i32
    %c0_i32_1 = arith.constant 0 : i32
    return %arg0, %c0_i32, %c0_i32_0 : i32, i32, i32
  }
  func.func @transform_1(%arg0: i32) -> (i32, i32) {
    %c0_i32 = arith.constant 0 : i32
    %c0_i32_0 = arith.constant 0 : i32
    return %arg0, %c0_i32 : i32, i32
  }
  func.func @transform_2(%arg0: i32) -> (i32, i32) {
    %c0_i32 = arith.constant 0 : i32
    %c0_i32_0 = arith.constant 0 : i32
    %c0_i32_1 = arith.constant 0 : i32
    return %c0_i32, %c0_i32_0 : i32, i32
  }
  func.func @transform_3(%arg0: i32) -> (i32, i32) {
    %c0_i32 = arith.constant 0 : i32
    %c0_i32_0 = arith.constant 0 : i32
    %c0_i32_1 = arith.constant 0 : i32
    return %c0_i32, %c0_i32_0 : i32, i32
  }
  func.func @transform_4(%arg0: i32) -> (i32, i32) {
    %c0_i32 = arith.constant 0 : i32
    %c0_i32_0 = arith.constant 0 : i32
    return %arg0, %c0_i32 : i32, i32
  }
  func.func @transform_5(%arg0: i32) -> (i32, i32) {
    %c0_i32 = arith.constant 0 : i32
    %c0_i32_0 = arith.constant 0 : i32
    return %arg0, %c0_i32 : i32, i32
  }
  func.func @transform_6(%arg0: i32) -> (i32, i32) {
    %c0_i32 = arith.constant 0 : i32
    %c0_i32_0 = arith.constant 0 : i32
    return %arg0, %c0_i32 : i32, i32
  }
  func.func @transform_7(%arg0: i32) -> (i32, i32) {
    %c0_i32 = arith.constant 0 : i32
    %c0_i32_0 = arith.constant 0 : i32
    return %arg0, %c0_i32 : i32, i32
  }
}

</mosaic_0001>

<bundles_post_ra>
// kernel: tpu_custom_call.1
= control target key start
LH: loop header
LB: loop body
LE: loop exit
PB: predicated region body
PF: predicated region fallthrough
CT: control target
= control target key end

     0   :  { %13 = vsyncpa [#allocation3], 0  ;;  %s475_s0 = inlined_call_operand.hbm [shape: f32[2,8,32], index: 0, kind: input, shape index: {}]   ;;  %s476_s1 = inlined_call_operand.vmem [shape: f32[2,8], index: 1, kind: input, shape index: {}]   ;;  %s477_s2 = inlined_call_operand.hbm [shape: f32[32,128], index: 2, kind: input, shape index: {}]   ;;  %s478_s3 = inlined_call_operand.vmem [shape: f32[1,128], index: 3, kind: input, shape index: {}]   ;;  %s479_s4 = inlined_call_operand.vmem [shape: s32[2,1], index: 4, kind: input, shape index: {}]   ;;  %s480_s5 = inlined_call_operand.vmem [shape: f32[2,1], index: 5, kind: input, shape index: {}]   ;;  %s481_s6 = inlined_call_operand.hbm [shape: f32[2,128], index: 6, kind: output, shape index: {0}]   ;;  %s482_s7 = inlined_call_operand.vmem [shape: f32[2,1], index: 7, kind: output, shape index: {1}]  }
   0x1   :  { %14 = vsyncpa [#allocation6], 0 }
   0x2   :  { %15 = vsyncpa [#allocation4], 0  ;;  %s363_s24 = smov [#allocation2]   ;;  %s291_s28 = scalar_lea.hbm %s475_s0, 256 }
   0x3   :  { %s21_s25 = sshll.u32 %s363_s24, 4  ;;  %p292_p0 = scmp.ne.s32.totalorder %s475_s0, %s291_s28  ;;  %s22_s25 = int_to_ptr.vmem [resolvable:$true] %s21_s25 }
   0x4   :  { %p295_p1 = scmp.lt.u32.totalorder %s291_s28, %s475_s0 }
   0x6   :  { %p297_p2 = pnand %p295_p1, %p292_p0 }
   0x8   :  { %300 = shalt.err (!%p297_p2)
}
   0x9   :  { %s301_s10 = scalar_lea.vmem %s22_s25, 256  ;;  %p306_p4 = scmp.lt.s32.totalorder %s22_s25, %s22_s25 }
   0xa   :  { %p302_p3 = scmp.ne.s32.totalorder %s22_s25, %s301_s10  ;;  %p307_p5 = scmp.lt.s32.totalorder %s301_s10, %s301_s10 }
   0xc   :  { %p308_p6 = por %p307_p5, %p306_p4 }
   0xe   :  { %p309_p7 = pnand %p308_p6, %p302_p3 }
  0x10   :  { %312 = shalt.err (!%p309_p7)
}
  0x11   :  { %s364_s11 = smov 128   ;;  %s365_s12 = smov 8  }
  0x12   :  { %27 = dma.hbm_to_vmem [thread:$0]  %s475_s0, 256, %s22_s25, [#allocation3], %s364_s11, %s364_s11, %s365_s12  }
  0x13   :  { %s366_s15 = smov [#allocation5]   ;;  %s313_s19 = scalar_lea.hbm %s477_s2, 512 }
  0x14   :  { %s35_s16 = sshll.u32 %s366_s15, 4  ;;  %p314_p8 = scmp.ne.s32.totalorder %s477_s2, %s313_s19  ;;  %s36_s16 = int_to_ptr.vmem [resolvable:$true] %s35_s16 }
  0x15   :  { %p317_p9 = scmp.lt.u32.totalorder %s313_s19, %s477_s2 }
  0x17   :  { %p319_p10 = pnand %p317_p9, %p314_p8 }
  0x19   :  { %322 = shalt.err (!%p319_p10)
}
  0x1a   :  { %s323_s24 = scalar_lea.vmem %s36_s16, 512  ;;  %p328_p12 = scmp.lt.s32.totalorder %s36_s16, %s36_s16 }
  0x1b   :  { %p324_p11 = scmp.ne.s32.totalorder %s36_s16, %s323_s24  ;;  %p329_p13 = scmp.lt.s32.totalorder %s323_s24, %s323_s24 }
  0x1d   :  { %p330_p0 = por %p329_p13, %p328_p12 }
  0x1f   :  { %p331_p1 = pnand %p330_p0, %p324_p11 }
  0x21   :  { %334 = shalt.err (!%p331_p1)
}
  0x22   :  { %41 = dma.hbm_to_vmem [thread:$0]  %s477_s2, 512, %s36_s16, [#allocation6], %s364_s11, %s364_s11, %s365_s12  }
  0x23   :  { %357 = dma.done.wait [#allocation3], 256  }
  0x24   :  { %358 = vsyncadd [#allocation3], 4294967040 }
  0x25   :  { %359 = dma.done.wait [#allocation6], 512  }
  0x26   :  { %360 = vsyncadd [#allocation6], 4294966784  ;;  %v57_v0 = vlaneseq  ;;  %vm88_vm0 = vcmask 58368   ;;  %v54_v3 = vld [vmem:[%s476_s1] sm:$0x3]  ;;  %v101_v8 = vld [vmem:[#allocation5] sm:$0xff] }
  0x27   :  { %v89_v4 = vsel %vm88_vm0, %v54_v3, 0.0  ;;  %v102_v9 = vld [vmem:[#allocation5 + $0x8] sm:$0xff]  ;;  %v367_v11 = vmov 0.0|0.0   ;;  %v103_v12 = vld [vmem:[#allocation5 + $0x10] sm:$0xff]  ;;  %v104_v13 = vld [vmem:[#allocation5 + $0x18] sm:$0xff]  ;;  %vm368_vm1 = vmmov 0  }
  0x28   :  { %v437_v1 = vshrl.u32 %v57_v0, 7  ;;  %90 = vadd.xlane.f32.xlu0 %v89_v4  ;;  %v268_v10 = vpack.c.bf16 %v102_v9, %v101_v8  ;;  %267 = vmatprep.subr.bf16.mxu0 %v367_v11  ;;  %v271_v14 = vpack.c.bf16 %v104_v13, %v103_v12  ;;  %v369_v15 = vmov 0.0   ;;  %v193_v16 = vld [vmem:[%s479_s4] sm:$0x3]  ;;  %v56_v26 = vld [vmem:[#allocation2 + $0x8] sm:$0xff] }
  0x29   :  { %264 = vmatprep.mubr.msk.f32.mxu0 %vm368_vm1, %v369_v15  ;;  %v370_v17 = vmov 0   ;;  %v55_v18 = vld [vmem:[#allocation2] sm:$0xff]  ;;  %vm73_vm2 = vcmask 261120   ;;  %vm115_vm3 = vcmask 1041409   ;;  %v191_v47 = vand.u32 127, %v57_v0 }
  0x2a   :  { %v59_v2 = vsub.s32 0, %v437_v1  ;;  %v66_v6 = vsub.s32 1, %v437_v1  ;;  %269 = vmatpush3.bf16.msra.mxu0 %v268_v10  ;;  %282 = vset.pattern.permute.xlu0 %v370_v17  ;;  %v249_v48 = vld [vmem:[%s478_s3] ss:$0 sm:$0xff]  ;;  %vm199_vm5 = vcmask 1041408   ;;  %s371_s3 = smov [#allocation7]  }
  0x2b   :  { %270 = vmatprep.subr.bf16.mxu0 %v367_v11  ;;  %vm192_vm4 = vcmp.lt.s32.totalorder %v191_v47, 4  ;;  %s235_s29 = sshll.u32 %s371_s3, 4  ;;  %s236_s29 = int_to_ptr.vmem [resolvable:$true] %s235_s29 }
  0x2c   :  { %v60_v5 = vrot.slane %v54_v3, %v59_v2  ;;  %v67_v7 = vrot.slane %v54_v3, %v66_v6  ;;  %s335_s30 = scalar_lea.vmem %s236_s29, 32  ;;  %p340_p3 = scmp.lt.s32.totalorder %s236_s29, %s236_s29 }
  0x2d   :  { %p336_p2 = scmp.ne.s32.totalorder %s236_s29, %s335_s30  ;;  %p341_p4 = scmp.lt.s32.totalorder %s335_s30, %s335_s30 }
  0x2e   :  { %62 = vbcast.lane.b32.xlu1 %v60_v5, 256  ;;  %272 = vmatpush3.bf16.msra.mxu0 %v271_v14 }
  0x2f   :  { %p342_p5 = por %p341_p4, %p340_p3 }
  0x31   :  { %p343_p6 = pnand %p342_p5, %p336_p2 }
  0x3e   :  { %69 = vbcast.lane.b32.xlu0 %v67_v7, 256 }
  0x42   :  { %195 = vperm.xlu0 %282, %v193_v16  }
  0xa0   :  { %v63_v19 = vpop.permute.xlu1 %62 }
  0xa1   :  { %v71_v20 = vmul.f32 %v63_v19, %v55_v18 }
  0xa3   :  { %v74_v21 = vsel %vm73_vm2, %v71_v20, 0.0 }
  0xa4   :  { %v75_v22 = vrot.slane %v74_v21, 4 }
  0xa6   :  { %v76_v25 = vadd.f32 %v75_v22, %v74_v21 }
  0xa8   :  { %v77_v30 = vrot.slane %v76_v25, 2 }
  0xaa   :  { %v78_v33 = vadd.f32 %v77_v30, %v76_v25 }
  0xac   :  { %v79_v36 = vrot.slane %v78_v33, 1 }
  0xae   :  { %v80_v40 = vadd.f32 %v79_v36, %v78_v33 }
  0xb5   :  { %v91_v23 = vpop.xlane.xlu0 %90 }
  0xb6   :  { %v92_v24 = vmax.f32 %v91_v23, 1e-09 }
  0xb8   :  { %v94_v28 = vrot.slane %v92_v24, 1  ;;  %283 = vrcp.f32 %v92_v24 }
  0xb9   :  { %v70_v27 = vpop.permute.xlu0 %69 }
  0xba   :  { %v72_v29 = vmul.f32 %v70_v27, %v56_v26  ;;  %285 = vrcp.f32 %v94_v28 }
  0xbc   :  { %v81_v31 = vsel %vm73_vm2, %v72_v29, 0.0 }
  0xbd   :  { %v82_v32 = vrot.slane %v81_v31, 4 }
  0xbf   :  { %v83_v34 = vadd.f32 %v82_v32, %v81_v31 }
  0xc1   :  { %v84_v35 = vrot.slane %v83_v34, 2  ;;  %v196_v49 = vpop.permute.xlu0 %195 }
  0xc2   :  { %v284_v39 = vpop.eup %283  ;;  %vm197_vm6 = vcmp.eq.s32.totalorder %v191_v47, %v196_v49 }
  0xc3   :  { %v85_v37 = vadd.f32 %v84_v35, %v83_v34  ;;  %v98_v44 = vmul.f32 %v284_v39, %v80_v40 }
  0xc4   :  { %v286_v42 = vpop.eup %285 }
  0xc5   :  { %v86_v38 = vrot.slane %v85_v37, 1 }
  0xc7   :  { %v87_v41 = vadd.f32 %v86_v38, %v85_v37 }
  0xc9   :  { %v100_v43 = vmul.f32 %v286_v42, %v87_v41 }
  0xcb   :  { %v114_v45 = vrot.slane %v100_v43, 7 }
  0xcd   :  { %v116_v46 = vsel %vm115_vm3, %v114_v45, %v98_v44 }
  0xce   :  { %265 = vmatmul.mubr.msk.f32.vlgmr.msra.gmra.mrb[0].mxu0 %vm73_vm2, %v116_v46 }
 0x1a1   :  { %v185_v50 = vpop.f32.mrb[0].mxu0 }
 0x1a2   :  { %v186_v51 = vadd.f32 %v249_v48, %v185_v50  ;;  %v266_v52 = vpop.f32.mrb[1].mxu0 }
 0x1a4   :  { %189 = vst [vmem:[#allocation7] sm:$0x3] %v186_v51  ;;  %v198_v53 = vsel %vm192_vm4, %v186_v51, -1e+30  ;;  %v213_v55 = vsel %vm197_vm6, %v186_v51, 0.0 }
 0x1a5   :  { %v200_v54 = vsel %vm199_vm5, %v198_v53, -inf  ;;  %v214_v56 = vsel %vm199_vm5, %v213_v55, 0.0 }
 0x1a6   :  { %201 = vmax.xlane.f32.xlu1 %v200_v54 }
 0x1aa   :  { %215 = vadd.xlane.f32.xlu1 %v214_v56 }
 0x233   :  { %v202_v57 = vpop.xlane.xlu1 %201 }
 0x234   :  { %v203_v58 = vsub.f32 %v198_v53, %v202_v57 }
 0x236   :  { %v204_v59 = vmul.f32 1.442695, %v203_v58 }
 0x238   :  { %287 = vpow2.f32 %v204_v59 }
 0x242   :  { %v288_v60 = vpop.eup %287 }
 0x243   :  { %v206_v61 = vsel %vm192_vm4, %v288_v60, 0.0 }
 0x244   :  { %v207_v62 = vsel %vm199_vm5, %v206_v61, 0.0 }
 0x245   :  { %208 = vadd.xlane.f32.xlu0 %v207_v62 }
 0x246   :  { %346 = shalt.err (!%p343_p6)
}
 0x247   :  { %s347_s10 = scalar_lea.hbm %s481_s6, 32 }
 0x248   :  { %p348_p7 = scmp.ne.s32.totalorder %s481_s6, %s347_s10  ;;  %p351_p8 = scmp.lt.u32.totalorder %s347_s10, %s481_s6 }
 0x24a   :  { %p353_p9 = pnand %p351_p8, %p348_p7 }
 0x24c   :  { %356 = shalt.err (!%p353_p9)
}
 0x24d   :  { %238 = dma.vmem_to_hbm [thread:$0]  %s236_s29, 32, %s481_s6, [#allocation4]   ;;  %v216_v4 = vpop.xlane.xlu1 %215  ;;  %v224_v5 = vld [vmem:[%s480_s5] sm:$0x3]  ;;  %vm222_vm7 = vcmp.lt.s32.totalorder %v437_v1, 2  ;;  %vm227_vm8 = vcmask 1024  }
 0x2d2   :  { %v209_v63 = vpop.xlane.xlu0 %208 }
 0x2d3   :  { %289 = vlog2.f32 %v209_v63 }
 0x2dd   :  { %v290_v0 = vpop.eup %289 }
 0x2de   :  { %v211_v2 = vmul.f32 0.6931472, %v290_v0 }
 0x2e0   :  { %v212_v3 = vadd.f32 %v211_v2, %v202_v57 }
 0x2e2   :  { %v223_v6 = vsub.f32 %v212_v3, %v216_v4 }
 0x2e4   :  { %v225_v7 = vmul.f32 %v224_v5, %v223_v6 }
 0x2e6   :  { %v226_v8 = vsel %vm222_vm7, %v225_v7, 0.0 }
 0x2e7   :  { %228 = vst.msk [vmem:[%s482_s7] sm:$0x3] %vm227_vm8, %v226_v8 }
 0x2e8   :  { %361 = dma.done.wait [#allocation4], 32  }
 0x2e9   :  { %362 = vsyncadd [#allocation4], 4294967264 }
 0x2ea   :  { %246 = vsyncpa [#allocation3], 1 }
 0x2eb   :  { %247 = vsyncpa [#allocation6], 1 }
 0x2ec   :  { %248 = vsyncpa [#allocation4], 1 }

</bundles_post_ra>
